<compile_context>
chip_gen: v6e
topology: v6e:2x2x1
jax: 0.10.0
libtpu: 0.0.40
codegen_flags: <defaults>
</compile_context>

<pallas_src>
import jax
import jax.numpy as jnp
from jax import lax
from jax.experimental import pallas as pl
from jax.experimental.pallas import tpu as pltpu

EPS = 1e-4
NEG_SLOPE = 0.05
_VMEM_LIMIT_BYTES = 48 * 1024 * 1024  # safe on v7x (64 MiB physical) and v5e/v6e


def _inorm_relu_kernel(x_ref, gamma_ref, beta_ref, o_ref):
    # x_ref: (N, tc) block — all N points for one lane-aligned tile of columns.
    x = x_ref[...].astype(jnp.float32)
    n = x.shape[0]
    inv_n = 1.0 / n

    # Two-pass centered statistics (biased variance == BatchNorm1d normalization).
    mean = jnp.sum(x, axis=0, keepdims=True) * inv_n              # (1, tc)
    centered = x - mean
    var = jnp.sum(centered * centered, axis=0, keepdims=True) * inv_n

    # Fold the affine scale into the inverse std (1 x tc work) so the
    # per-element path is a single mul + add instead of two muls + add.
    scale = lax.rsqrt(var + EPS) * gamma_ref[...].astype(jnp.float32)
    y = centered * scale + beta_ref[...].astype(jnp.float32)

    # LeakyReLU(0.05): max(y, slope*y) is exact for 0 < slope < 1.
    y = jnp.maximum(y, NEG_SLOPE * y)

    o_ref[...] = y.astype(o_ref.dtype)


def _choose_channel_tile(n, c):
    # Small/medium problems: one full-width block, stats fully in-kernel.
    if n * c <= 2 * 1024 * 1024:          # <= ~8 MiB f32 working block
        return c
    # Otherwise tile the column axis in lane-aligned multiples of 128, keeping
    # the f32 working block ~3 MiB so double-buffered in/out + temps stay well
    # under the scoped VMEM limit (also leaves headroom on v7x's 64 MiB VMEM).
    budget_elems = 768 * 1024
    tc = (budget_elems // max(n, 1)) // 128 * 128
    return int(max(128, min(tc, c)))


def _norm_relu_2d(features, gamma2d, beta2d):
    n, c = features.shape
    tc = _choose_channel_tile(n, c)
    grid = (pl.cdiv(c, tc),)
    return pl.pallas_call(
        _inorm_relu_kernel,
        out_shape=jax.ShapeDtypeStruct((n, c), features.dtype),
        grid_spec=pltpu.PrefetchScalarGridSpec(
            num_scalar_prefetch=0,
            grid=grid,
            in_specs=[
                pl.BlockSpec((n, tc), lambda j: (0, j)),
                pl.BlockSpec((1, tc), lambda j: (0, j)),
                pl.BlockSpec((1, tc), lambda j: (0, j)),
            ],
            out_specs=pl.BlockSpec((n, tc), lambda j: (0, j)),
        ),
        compiler_params=pltpu.CompilerParams(
            dimension_semantics=("parallel",),
            vmem_limit_bytes=_VMEM_LIMIT_BYTES,
        ),
    )(features, gamma2d, beta2d)


def instance_norm_relu(features, gamma, beta):
    """Normalize + LeakyReLU.

    features: (N, C) single feature matrix, or (B, N, C) batch of independent
              instances (each normalized with its own per-channel stats).
    gamma/beta: (C,) affine parameters.
    """
    if features.ndim == 2:
        n, c = features.shape
        return _norm_relu_2d(features, gamma.reshape(1, c), beta.reshape(1, c))

    # Batched, lane-dense path: pack the B*C per-(instance, channel) columns on
    # the lane axis so every vreg/store is fully dense. Stats for column
    # (b, c) are computed over exactly instance b's N rows, so semantics match
    # applying the module to each instance independently.
    b, n, c = features.shape
    packed = jnp.transpose(features, (1, 0, 2)).reshape(n, b * c)
    gamma_p = jnp.tile(gamma, b).reshape(1, b * c)
    beta_p = jnp.tile(beta, b).reshape(1, b * c)
    out = _norm_relu_2d(packed, gamma_p, beta_p)
    return jnp.transpose(out.reshape(n, b, c), (1, 0, 2))
    # NOTE: for N too large to keep an (N, tc) block resident, a two-phase
    # scheme (N-grid accumulating sum/sumsq, then a normalize pass) would be
    # needed; not required at the sizes this module is used with.


def _reference(features, gamma, beta):
    x = features.astype(jnp.float32)
    mean = jnp.mean(x, axis=0, keepdims=True)
    var = jnp.mean((x - mean) ** 2, axis=0, keepdims=True)  # biased
    xhat = (x - mean) / jnp.sqrt(var + EPS)
    y = xhat * gamma[None, :] + beta[None, :]
    return jnp.where(y >= 0, y, NEG_SLOPE * y).astype(features.dtype)


if __name__ == "__main__":
    key = jax.random.PRNGKey(0)
    k_x, k_g, k_b, k_xb = jax.random.split(key, 4)

    N = 64            # number of sparse points (rows of x.features)
    LATENT_DIM = 32   # channels

    features = jax.random.normal(k_x, (N, LATENT_DIM), dtype=jnp.float32) * 2.0 + 0.5
    gamma = 1.0 + 0.1 * jax.random.normal(k_g, (LATENT_DIM,), dtype=jnp.float32)
    beta = 0.1 * jax.random.normal(k_b, (LATENT_DIM,), dtype=jnp.float32)

    # Single-instance path (matches the module's forward exactly).
    out = jax.block_until_ready(instance_norm_relu(features, gamma, beta))
    ref = _reference(features, gamma, beta)
    assert jnp.allclose(out, ref, atol=1e-5, rtol=1e-5), "single-instance mismatch"

    # Lane-dense batched path: 8 instances -> 8*32 = 256 lanes (full vregs,
    # unmasked stores).
    B = 8
    feats_b = jax.random.normal(k_xb, (B, N, LATENT_DIM), dtype=jnp.float32) * 2.0 + 0.5
    out_b = jax.block_until_ready(instance_norm_relu(feats_b, gamma, beta))
    ref_b = jax.vmap(lambda f: _reference(f, gamma, beta))(feats_b)
    assert jnp.allclose(out_b, ref_b, atol=1e-5, rtol=1e-5), "batched mismatch"

    # TODO(synk): the sparse-tensor container (x.features get/set) has no Pallas
    # equivalent; only the dense (N, C) feature hot path is implemented here.
    print("KERNEL_OK")
</pallas_src>

<mosaic_0001>
module attributes {stable_mosaic.version = 11 : i64} {
  func.func @_inorm_relu_kernel(%arg0: i32, %arg1: memref<64x32xf32, #tpu.memory_space<vmem>>, %arg2: memref<1x32xf32, #tpu.memory_space<vmem>>, %arg3: memref<1x32xf32, #tpu.memory_space<vmem>>, %arg4: memref<64x32xf32, #tpu.memory_space<vmem>>) attributes {dimension_semantics = [#tpu.dimension_semantics<parallel>], iteration_bounds = array<i64: 1>, scalar_prefetch = 0 : i64, scratch_operands = 0 : i64, tpu.core_type = #tpu.core_type<tc>, window_params = [{transform_indices = @transform_0, window_bounds = array<i64: 64, 32>}, {transform_indices = @transform_1, window_bounds = array<i64: 1, 32>}, {transform_indices = @transform_2, window_bounds = array<i64: 1, 32>}, {transform_indices = @transform_3, window_bounds = array<i64: 64, 32>}]} {
    %c0 = arith.constant 0 : index
    %c0_0 = arith.constant 0 : index
    %0 = vector.load %arg1[%c0, %c0_0] : memref<64x32xf32, #tpu.memory_space<vmem>>, vector<64x32xf32>
    %cst = arith.constant dense<0.000000e+00> : vector<32xf32>
    %1 = vector.multi_reduction <add>, %0, %cst [0] : vector<64x32xf32> to vector<32xf32>
    %2 = vector.shape_cast %1 : vector<32xf32> to vector<1x32xf32>
    %cst_1 = arith.constant 1.562500e-02 : f32
    %3 = vector.broadcast %cst_1 : f32 to vector<1x32xf32>
    %4 = arith.mulf %2, %3 : vector<1x32xf32>
    %5 = vector.broadcast %4 : vector<1x32xf32> to vector<64x32xf32>
    %6 = arith.subf %0, %5 : vector<64x32xf32>
    %7 = arith.mulf %6, %6 : vector<64x32xf32>
    %cst_2 = arith.constant dense<0.000000e+00> : vector<32xf32>
    %8 = vector.multi_reduction <add>, %7, %cst_2 [0] : vector<64x32xf32> to vector<32xf32>
    %9 = vector.shape_cast %8 : vector<32xf32> to vector<1x32xf32>
    %cst_3 = arith.constant 1.562500e-02 : f32
    %10 = vector.broadcast %cst_3 : f32 to vector<1x32xf32>
    %11 = arith.mulf %9, %10 : vector<1x32xf32>
    %cst_4 = arith.constant 9.99999974E-5 : f32
    %12 = vector.broadcast %cst_4 : f32 to vector<1x32xf32>
    %13 = arith.addf %11, %12 : vector<1x32xf32>
    %14 = math.rsqrt %13 : vector<1x32xf32>
    %c0_5 = arith.constant 0 : index
    %c0_6 = arith.constant 0 : index
    %15 = vector.load %arg2[%c0_5, %c0_6] : memref<1x32xf32, #tpu.memory_space<vmem>>, vector<1x32xf32>
    %16 = arith.mulf %14, %15 : vector<1x32xf32>
    %17 = vector.broadcast %16 : vector<1x32xf32> to vector<64x32xf32>
    %18 = arith.mulf %6, %17 : vector<64x32xf32>
    %c0_7 = arith.constant 0 : index
    %c0_8 = arith.constant 0 : index
    %19 = vector.load %arg3[%c0_7, %c0_8] : memref<1x32xf32, #tpu.memory_space<vmem>>, vector<1x32xf32>
    %20 = vector.broadcast %19 : vector<1x32xf32> to vector<64x32xf32>
    %21 = arith.addf %18, %20 : vector<64x32xf32>
    %cst_9 = arith.constant 5.000000e-02 : f32
    %22 = vector.broadcast %cst_9 : f32 to vector<64x32xf32>
    %23 = arith.mulf %22, %21 : vector<64x32xf32>
    %24 = arith.maximumf %21, %23 : vector<64x32xf32>
    %c0_10 = arith.constant 0 : index
    %c0_11 = arith.constant 0 : index
    %25 = vector.load %arg4[%c0_10, %c0_11] : memref<64x32xf32, #tpu.memory_space<vmem>>, vector<64x32xf32>
    tpu.vector_store %arg4[%c0_10, %c0_11], %24 {strides = array<i32>} : memref<64x32xf32, #tpu.memory_space<vmem>>, vector<64x32xf32>,
    return
  }
  func.func @transform_0(%arg0: i32) -> (i32, i32) {
    %c0_i32 = arith.constant 0 : i32
    %c0_i32_0 = arith.constant 0 : i32
    return %c0_i32, %arg0 : i32, i32
  }
  func.func @transform_1(%arg0: i32) -> (i32, i32) {
    %c0_i32 = arith.constant 0 : i32
    %c0_i32_0 = arith.constant 0 : i32
    return %c0_i32, %arg0 : i32, i32
  }
  func.func @transform_2(%arg0: i32) -> (i32, i32) {
    %c0_i32 = arith.constant 0 : i32
    %c0_i32_0 = arith.constant 0 : i32
    return %c0_i32, %arg0 : i32, i32
  }
  func.func @transform_3(%arg0: i32) -> (i32, i32) {
    %c0_i32 = arith.constant 0 : i32
    %c0_i32_0 = arith.constant 0 : i32
    return %c0_i32, %arg0 : i32, i32
  }
}

</mosaic_0001>

<bundles_post_ra>
// kernel: tpu_custom_call.1
= control target key start
LH: loop header
LB: loop body
LE: loop exit
PB: predicated region body
PF: predicated region fallthrough
CT: control target
= control target key end

     0   :  { %vm22_vm0 = vcmask 261120   ;;  %s243_s0 = inlined_call_operand.vmem [shape: f32[64,32], index: 0, kind: input, shape index: {}]   ;;  %s244_s1 = inlined_call_operand.vmem [shape: f32[1,32], index: 1, kind: input, shape index: {}]   ;;  %s245_s2 = inlined_call_operand.vmem [shape: f32[1,32], index: 2, kind: input, shape index: {}]   ;;  %s246_s3 = inlined_call_operand.vmem [shape: f32[64,32], index: 3, kind: output, shape index: {}]  }
   0x1   :  { %v14_v0 = vld [vmem:[%s243_s0] sm:$0xff]  ;;  %v15_v1 = vld [vmem:[%s243_s0 + $0x8] sm:$0xff]  ;;  %v16_v2 = vld [vmem:[%s243_s0 + $0x10] sm:$0xff] }
   0x2   :  { %v17_v3 = vld [vmem:[%s243_s0 + $0x18] sm:$0xff]  ;;  %v23_v4 = vsel %vm22_vm0, %v14_v0, 0.0  ;;  %v24_v5 = vsel %vm22_vm0, %v15_v1, 0.0  ;;  %v26_v6 = vsel %vm22_vm0, %v16_v2, 0.0  ;;  %v18_v7 = vld [vmem:[%s243_s0 + $0x20] sm:$0xff]  ;;  %v19_v10 = vld [vmem:[%s243_s0 + $0x28] sm:$0xff] }
   0x3   :  { %v25_v8 = vadd.f32 %v24_v5, %v23_v4  ;;  %v28_v9 = vsel %vm22_vm0, %v17_v3, 0.0  ;;  %v30_v12 = vsel %vm22_vm0, %v18_v7, 0.0  ;;  %v20_v13 = vld [vmem:[%s243_s0 + $0x30] sm:$0xff]  ;;  %v32_v15 = vsel %vm22_vm0, %v19_v10, 0.0  ;;  %v21_v16 = vld [vmem:[%s243_s0 + $0x38] sm:$0xff] }
   0x4   :  { %v34_v18 = vsel %vm22_vm0, %v20_v13, 0.0  ;;  %v36_v20 = vsel %vm22_vm0, %v21_v16, 0.0  ;;  %v87_v5 = vlaneseq }
   0x5   :  { %v27_v11 = vadd.f32 %v26_v6, %v25_v8 }
   0x6   :  { %v88_v6 = vshrl.u32 %v87_v5, 7 }
   0x7   :  { %v29_v14 = vadd.f32 %v28_v9, %v27_v11 }
   0x8   :  { %v89_v8 = vsub.s32 0, %v88_v6 }
   0x9   :  { %v31_v17 = vadd.f32 %v30_v12, %v29_v14  ;;  %v142_v12 = vld [vmem:[%s245_s2] ss:$0 sm:$0xff] }
   0xb   :  { %v33_v19 = vadd.f32 %v32_v15, %v31_v17 }
   0xd   :  { %v35_v21 = vadd.f32 %v34_v18, %v33_v19 }
   0xf   :  { %v37_v22 = vadd.f32 %v36_v20, %v35_v21 }
  0x11   :  { %v38_v23 = vrot.slane %v37_v22, 4 }
  0x13   :  { %v39_v24 = vadd.f32 %v38_v23, %v37_v22 }
  0x15   :  { %v40_v25 = vrot.slane %v39_v24, 2 }
  0x17   :  { %v41_v26 = vadd.f32 %v40_v25, %v39_v24 }
  0x19   :  { %v42_v27 = vrot.slane %v41_v26, 1 }
  0x1b   :  { %v43_v28 = vadd.f32 %v42_v27, %v41_v26 }
  0x1d   :  { %v44_v29 = vmul.f32 0.015625, %v43_v28 }
  0x1f   :  { %v45_v30 = vsub.f32 %v14_v0, %v44_v29  ;;  %v46_v31 = vsub.f32 %v15_v1, %v44_v29  ;;  %v47_v32 = vsub.f32 %v16_v2, %v44_v29  ;;  %v48_v33 = vsub.f32 %v17_v3, %v44_v29 }
  0x20   :  { %v49_v34 = vsub.f32 %v18_v7, %v44_v29  ;;  %v50_v35 = vsub.f32 %v19_v10, %v44_v29  ;;  %v51_v40 = vsub.f32 %v20_v13, %v44_v29  ;;  %v52_v46 = vsub.f32 %v21_v16, %v44_v29  ;;  %v85_v7 = vld [vmem:[%s244_s1] sm:$0x1] }
  0x21   :  { %v53_v36 = vmul.f32 %v45_v30, %v45_v30  ;;  %v54_v37 = vmul.f32 %v46_v31, %v46_v31  ;;  %v55_v38 = vmul.f32 %v47_v32, %v47_v32  ;;  %v56_v39 = vmul.f32 %v48_v33, %v48_v33 }
  0x22   :  { %v57_v41 = vmul.f32 %v49_v34, %v49_v34  ;;  %v58_v47 = vmul.f32 %v50_v35, %v50_v35  ;;  %v59_v50 = vmul.f32 %v51_v40, %v51_v40  ;;  %v60_v53 = vmul.f32 %v52_v46, %v52_v46 }
  0x23   :  { %v61_v42 = vsel %vm22_vm0, %v53_v36, 0.0  ;;  %v62_v43 = vsel %vm22_vm0, %v54_v37, 0.0  ;;  %v64_v44 = vsel %vm22_vm0, %v55_v38, 0.0  ;;  %v66_v48 = vsel %vm22_vm0, %v56_v39, 0.0 }
  0x24   :  { %v63_v45 = vadd.f32 %v62_v43, %v61_v42  ;;  %v68_v51 = vsel %vm22_vm0, %v57_v41, 0.0  ;;  %v70_v54 = vsel %vm22_vm0, %v58_v47, 0.0  ;;  %v72_v56 = vsel %vm22_vm0, %v59_v50, 0.0 }
  0x25   :  { %v74_v58 = vsel %vm22_vm0, %v60_v53, 0.0 }
  0x26   :  { %v65_v49 = vadd.f32 %v64_v44, %v63_v45 }
  0x28   :  { %v67_v52 = vadd.f32 %v66_v48, %v65_v49 }
  0x2a   :  { %v69_v55 = vadd.f32 %v68_v51, %v67_v52 }
  0x2c   :  { %v71_v57 = vadd.f32 %v70_v54, %v69_v55 }
  0x2e   :  { %v73_v59 = vadd.f32 %v72_v56, %v71_v57 }
  0x30   :  { %v75_v60 = vadd.f32 %v74_v58, %v73_v59 }
  0x32   :  { %v76_v61 = vrot.slane %v75_v60, 4 }
  0x34   :  { %v77_v62 = vadd.f32 %v76_v61, %v75_v60 }
  0x36   :  { %v78_v63 = vrot.slane %v77_v62, 2 }
  0x38   :  { %v79_v0 = vadd.f32 %v78_v63, %v77_v62 }
  0x3a   :  { %v80_v1 = vrot.slane %v79_v0, 1 }
  0x3c   :  { %v81_v2 = vadd.f32 %v80_v1, %v79_v0 }
  0x3e   :  { %v82_v3 = vmul.f32 0.015625, %v81_v2 }
  0x40   :  { %v83_v4 = vadd.f32 0.0001, %v82_v3 }
  0x42   :  { %143 = vrsqrt.f32 %v83_v4 }
  0x4f   :  { %v144_v9 = vpop.eup %143 }
  0x50   :  { %v86_v10 = vmul.f32 %v144_v9, %v85_v7 }
  0x52   :  { %v90_v11 = vrot.slane %v86_v10, %v89_v8 }
  0x54   :  { %v91_v13 = vmul.f32 %v90_v11, %v45_v30  ;;  %v92_v14 = vmul.f32 %v90_v11, %v46_v31  ;;  %v93_v15 = vmul.f32 %v90_v11, %v47_v32  ;;  %v94_v16 = vmul.f32 %v90_v11, %v48_v33 }
  0x55   :  { %v95_v17 = vmul.f32 %v90_v11, %v49_v34  ;;  %v96_v18 = vmul.f32 %v90_v11, %v50_v35  ;;  %v97_v19 = vmul.f32 %v90_v11, %v51_v40  ;;  %v98_v20 = vmul.f32 %v90_v11, %v52_v46 }
  0x56   :  { %v106_v21 = vadd.f32 %v142_v12, %v91_v13  ;;  %v107_v22 = vadd.f32 %v142_v12, %v92_v14  ;;  %v108_v23 = vadd.f32 %v142_v12, %v93_v15  ;;  %v109_v24 = vadd.f32 %v142_v12, %v94_v16 }
  0x57   :  { %v110_v25 = vadd.f32 %v142_v12, %v95_v17  ;;  %v111_v26 = vadd.f32 %v142_v12, %v96_v18  ;;  %v112_v27 = vadd.f32 %v142_v12, %v97_v19  ;;  %v113_v28 = vadd.f32 %v142_v12, %v98_v20 }
  0x58   :  { %v114_v29 = vmul.f32 0.05, %v106_v21  ;;  %v115_v36 = vmul.f32 0.05, %v107_v22  ;;  %v116_v37 = vmul.f32 0.05, %v108_v23 }
  0x59   :  { %v117_v38 = vmul.f32 0.05, %v109_v24  ;;  %v118_v30 = vmul.f32 0.05, %v110_v25  ;;  %v119_v31 = vmul.f32 0.05, %v111_v26 }
  0x5a   :  { %v122_v32 = vmax.f32 %v106_v21, %v114_v29  ;;  %v123_v33 = vmax.f32 %v107_v22, %v115_v36  ;;  %v124_v34 = vmax.f32 %v108_v23, %v116_v37  ;;  %v120_v35 = vmul.f32 0.05, %v112_v27 }
  0x5b   :  { %v125_v39 = vmax.f32 %v109_v24, %v117_v38  ;;  %v126_v40 = vmax.f32 %v110_v25, %v118_v30  ;;  %v127_v41 = vmax.f32 %v111_v26, %v119_v31  ;;  %v121_v42 = vmul.f32 0.05, %v113_v28 }
  0x5c   :  { %130 = vst.msk [vmem:[%s246_s3] sm:$0xff] %vm22_vm0, %v122_v32  ;;  %131 = vst.msk [vmem:[%s246_s3 + $0x8] sm:$0xff] %vm22_vm0, %v123_v33  ;;  %v128_v43 = vmax.f32 %v112_v27, %v120_v35 }
  0x5d   :  { %132 = vst.msk [vmem:[%s246_s3 + $0x10] sm:$0xff] %vm22_vm0, %v124_v34  ;;  %133 = vst.msk [vmem:[%s246_s3 + $0x18] sm:$0xff] %vm22_vm0, %v125_v39  ;;  %v129_v44 = vmax.f32 %v113_v28, %v121_v42 }
  0x5e   :  { %134 = vst.msk [vmem:[%s246_s3 + $0x20] sm:$0xff] %vm22_vm0, %v126_v40  ;;  %135 = vst.msk [vmem:[%s246_s3 + $0x28] sm:$0xff] %vm22_vm0, %v127_v41 }
  0x5f   :  { %136 = vst.msk [vmem:[%s246_s3 + $0x30] sm:$0xff] %vm22_vm0, %v128_v43  ;;  %137 = vst.msk [vmem:[%s246_s3 + $0x38] sm:$0xff] %vm22_vm0, %v129_v44 }

</bundles_post_ra>
